<compile_context>
chip_gen: v7x
topology: tpu7x:2x2x1
jax: 0.10.0
libtpu: 0.0.40
codegen_flags: <defaults>
</compile_context>

<pallas_src>
import functools

import jax
import jax.numpy as jnp
from jax.experimental import pallas as pl
from jax.experimental.pallas import tpu as pltpu


def _cross_attn_kernel(x_ref, wqkv_ref, wp_ref, bp_ref, o_ref, *,
                       num_heads, scale, block_q):
    N, C = x_ref.shape[1], x_ref.shape[2]
    H = num_heads
    Dh = C // H
    cdt = wqkv_ref.dtype                      # MXU operand dtype (bf16 or f32)

    x = x_ref[0]                              # (N, C), compute dtype
    w_qkv = wqkv_ref[...]                     # (C, 3C), columns = [q | k | v]

    if block_q == N:
        # Single q tile: one wide fused projection pass -> (N, 3C).
        qkv = jnp.dot(x, w_qkv, preferred_element_type=jnp.float32)
        q, k, v = qkv[:, :C], qkv[:, C:2 * C], qkv[:, 2 * C:]
    else:
        # Tiled queries: q only for this tile, k/v for the full sequence.
        qi = pl.program_id(1)
        start = pl.multiple_of(qi * block_q, block_q)
        x_q = x_ref[0, pl.ds(start, block_q), :]
        q = jnp.dot(x_q, w_qkv[:, :C], preferred_element_type=jnp.float32)
        kv = jnp.dot(x, w_qkv[:, C:], preferred_element_type=jnp.float32)
        k, v = kv[:, :C], kv[:, C:]

    # f32 accumulation results; cast back to operand dtype for the MXU.
    q = (q * scale).astype(cdt)               # (Nq, C)
    k = k.astype(cdt)                         # (N,  C)
    v = v.astype(cdt)                         # (N,  C)

    # Heads -> leading batch axis: (H, Nq, Dh) / (H, N, Dh).
    q3 = jnp.stack([q[:, h * Dh:(h + 1) * Dh] for h in range(H)], axis=0)
    k3 = jnp.stack([k[:, h * Dh:(h + 1) * Dh] for h in range(H)], axis=0)
    v3 = jnp.stack([v[:, h * Dh:(h + 1) * Dh] for h in range(H)], axis=0)

    # Head-batched attention; softmax kept in f32.
    s = jnp.einsum('hqd,hkd->hqk', q3, k3,
                   preferred_element_type=jnp.float32)       # (H, Nq, N)
    s = s - jnp.max(s, axis=-1, keepdims=True)
    p = jnp.exp(s)
    p = p * pl.reciprocal(jnp.sum(p, axis=-1, keepdims=True), approx=True)
    o = jnp.einsum('hqk,hkd->hqd', p.astype(cdt), v3,
                   preferred_element_type=jnp.float32)       # (H, Nq, Dh)

    # Back to (Nq, C), output projection (bias added in f32).
    out = jnp.concatenate([o[h] for h in range(H)], axis=-1)  # (Nq, C)
    out = jnp.dot(out.astype(cdt), wp_ref[...],
                  preferred_element_type=jnp.float32) + bp_ref[...]
    o_ref[0] = out.astype(o_ref.dtype)


def cross_attention(x, q_c, params, *, num_heads,
                    compute_dtype=jnp.bfloat16, block_q=None):
    """x: (B, N, C).  q_c accepted for API parity but unused (as in PyTorch)."""
    del q_c  # unused in the reference forward pass
    B, N, C = x.shape
    if C % num_heads != 0:
        raise ValueError(f"C={C} must be divisible by num_heads={num_heads}")
    head_dim = C // num_heads
    scale = head_dim ** (-0.5)

    if block_q is None:
        block_q = 128 if (N % 128 == 0) else N
    if N % block_q != 0:
        block_q = N
    nq = N // block_q

    out_dtype = x.dtype
    # Fuse q + kv weights into one matrix, pre-transposed to (in, out) layout:
    # columns [0:C)=q, [C:2C)=k, [2C:3C)=v (matches kv.reshape(...,2,H,Dh)).
    w_qkv = jnp.concatenate([params["q_w"], params["kv_w"]], axis=0).T
    w_qkv = w_qkv.astype(compute_dtype)                      # (C, 3C)
    w_p = params["proj_w"].T.astype(compute_dtype)           # (C, C)
    b_p = params["proj_b"].reshape(1, C).astype(jnp.float32)  # (1, C)
    x_c = x.astype(compute_dtype)

    kernel = functools.partial(_cross_attn_kernel, num_heads=num_heads,
                               scale=scale, block_q=block_q)
    return pl.pallas_call(
        kernel,
        out_shape=jax.ShapeDtypeStruct((B, N, C), out_dtype),
        grid_spec=pltpu.PrefetchScalarGridSpec(
            num_scalar_prefetch=0,
            grid=(B, nq),
            in_specs=[
                pl.BlockSpec((1, N, C), lambda b, qi: (b, 0, 0)),     # x (full seq)
                pl.BlockSpec((C, 3 * C), lambda b, qi: (0, 0)),       # fused qkv W
                pl.BlockSpec((C, C), lambda b, qi: (0, 0)),           # proj W
                pl.BlockSpec((1, C), lambda b, qi: (0, 0)),           # proj bias
            ],
            out_specs=pl.BlockSpec((1, block_q, C), lambda b, qi: (b, qi, 0)),
        ),
        compiler_params=pltpu.CompilerParams(
            dimension_semantics=("parallel", "parallel"),
            vmem_limit_bytes=64 * 1024 * 1024,
        ),
    )(x_c, w_qkv, w_p, b_p)


def cross_attention_ref(x, params, *, num_heads):
    """Plain-JAX f32 reference mirroring the PyTorch forward."""
    B, N, C = x.shape
    head_dim = C // num_heads
    scale = head_dim ** (-0.5)
    kv = x @ params["kv_w"].T                                 # (B, N, 2C)
    kv = kv.reshape(B, N, 2, num_heads, head_dim).transpose(2, 0, 3, 1, 4)
    k, v = kv[0], kv[1]                                       # (B, H, N, Dh)
    q = (x @ params["q_w"].T).reshape(B, N, num_heads, head_dim)
    q = q.transpose(0, 2, 1, 3) * scale
    attn = jax.nn.softmax(q @ k.transpose(0, 1, 3, 2), axis=-1)
    out = (attn @ v).transpose(0, 2, 1, 3).reshape(B, N, C)
    return out @ params["proj_w"].T + params["proj_b"]


if __name__ == "__main__":
    B, N, C, H = 2, 8, 32, 4   # batch, seq, dim, num_heads  (head_dim = 8)
    key = jax.random.PRNGKey(0)
    kx, kq, kkv, kp, kb, kqc = jax.random.split(key, 6)

    x = jax.random.normal(kx, (B, N, C), dtype=jnp.float32)
    q_c = jax.random.normal(kqc, (B, N, C), dtype=jnp.float32)  # unused (as in PyTorch)

    # Deterministic synthetic parameters (nn.Linear layout: weight is (out, in)).
    params = {
        "q_w":    0.1 * jax.random.normal(kq,  (C, C),     dtype=jnp.float32),
        "kv_w":   0.1 * jax.random.normal(kkv, (2 * C, C), dtype=jnp.float32),
        "proj_w": 0.1 * jax.random.normal(kp,  (C, C),     dtype=jnp.float32),
        "proj_b": 0.1 * jax.random.normal(kb,  (C,),       dtype=jnp.float32),
    }

    ref = cross_attention_ref(x, params, num_heads=H)

    # f32 operand path (exact math apart from the approx reciprocal).
    out_f32 = jax.block_until_ready(
        cross_attention(x, q_c, params, num_heads=H, compute_dtype=jnp.float32))
    assert out_f32.shape == (B, N, C)
    err_f32 = float(jnp.max(jnp.abs(out_f32 - ref)))
    assert err_f32 < 1e-2, f"f32 Pallas kernel mismatch vs reference: {err_f32}"

    # bf16 MXU-operand path (default; f32 accumulation and softmax).
    out_bf16 = jax.block_until_ready(
        cross_attention(x, q_c, params, num_heads=H, compute_dtype=jnp.bfloat16))
    assert out_bf16.shape == (B, N, C)
    err_bf16 = float(jnp.max(jnp.abs(out_bf16 - ref)))
    assert err_bf16 < 7e-2, f"bf16 Pallas kernel mismatch vs reference: {err_bf16}"

    print("KERNEL_OK")
</pallas_src>

<mosaic_0001>
module attributes {stable_mosaic.version = 11 : i64} {
  func.func @_cross_attn_kernel(%arg0: i32, %arg1: i32, %arg2: memref<1x8x32xf32, #tpu.memory_space<vmem>>, %arg3: memref<32x96xf32, #tpu.memory_space<vmem>>, %arg4: memref<32x32xf32, #tpu.memory_space<vmem>>, %arg5: memref<1x32xf32, #tpu.memory_space<vmem>>, %arg6: memref<1x8x32xf32, #tpu.memory_space<vmem>>) attributes {dimension_semantics = [#tpu.dimension_semantics<parallel>, #tpu.dimension_semantics<parallel>], iteration_bounds = array<i64: 2, 1>, scalar_prefetch = 0 : i64, scratch_operands = 0 : i64, tpu.core_type = #tpu.core_type<tc>, window_params = [{transform_indices = @transform_0, window_bounds = array<i64: 1, 8, 32>}, {pipeline_mode = #tpu.pipeline_mode<synchronous>, transform_indices = @transform_1, window_bounds = array<i64: 32, 96>}, {pipeline_mode = #tpu.pipeline_mode<synchronous>, transform_indices = @transform_2, window_bounds = array<i64: 32, 32>}, {pipeline_mode = #tpu.pipeline_mode<synchronous>, transform_indices = @transform_3, window_bounds = array<i64: 1, 32>}, {transform_indices = @transform_4, window_bounds = array<i64: 1, 8, 32>}]} {
    %c0 = arith.constant 0 : index
    %c0_0 = arith.constant 0 : index
    %c0_1 = arith.constant 0 : index
    %0 = vector.load %arg2[%c0, %c0_0, %c0_1] : memref<1x8x32xf32, #tpu.memory_space<vmem>>, vector<1x8x32xf32>
    %1 = vector.shape_cast %0 : vector<1x8x32xf32> to vector<8x32xf32>
    %c0_2 = arith.constant 0 : index
    %c0_3 = arith.constant 0 : index
    %2 = vector.load %arg3[%c0_2, %c0_3] : memref<32x96xf32, #tpu.memory_space<vmem>>, vector<32x96xf32>
    %cst = arith.constant dense<0.000000e+00> : vector<8x96xf32>
    %3 = tpu.matmul %1, %2, %cst {dimension_numbers = #tpu.dot_dimension_numbers<[1], [0], [0], [1], [0, 0, 1, 1], [], []>} : vector<8x32xf32>, vector<32x96xf32>, vector<8x96xf32> -> vector<8x96xf32>
    %4 = vector.extract_strided_slice %3 {offsets = [0, 0], sizes = [8, 32], strides = [1, 1]} : vector<8x96xf32> to vector<8x32xf32>
    %5 = vector.extract_strided_slice %3 {offsets = [0, 32], sizes = [8, 32], strides = [1, 1]} : vector<8x96xf32> to vector<8x32xf32>
    %6 = vector.extract_strided_slice %3 {offsets = [0, 64], sizes = [8, 32], strides = [1, 1]} : vector<8x96xf32> to vector<8x32xf32>
    %cst_4 = arith.constant 0.353553385 : f32
    %7 = vector.broadcast %cst_4 : f32 to vector<8x32xf32>
    %8 = arith.mulf %4, %7 : vector<8x32xf32>
    %9 = vector.extract_strided_slice %8 {offsets = [0, 0], sizes = [8, 8], strides = [1, 1]} : vector<8x32xf32> to vector<8x8xf32>
    %10 = vector.extract_strided_slice %8 {offsets = [0, 8], sizes = [8, 8], strides = [1, 1]} : vector<8x32xf32> to vector<8x8xf32>
    %11 = vector.extract_strided_slice %8 {offsets = [0, 16], sizes = [8, 8], strides = [1, 1]} : vector<8x32xf32> to vector<8x8xf32>
    %12 = vector.extract_strided_slice %8 {offsets = [0, 24], sizes = [8, 8], strides = [1, 1]} : vector<8x32xf32> to vector<8x8xf32>
    %13 = vector.shape_cast %9 : vector<8x8xf32> to vector<1x8x8xf32>
    %14 = vector.shape_cast %10 : vector<8x8xf32> to vector<1x8x8xf32>
    %15 = vector.shape_cast %11 : vector<8x8xf32> to vector<1x8x8xf32>
    %16 = vector.shape_cast %12 : vector<8x8xf32> to vector<1x8x8xf32>
    %17 = tpu.concatenate %13, %14, %15, %16 in 0 : vector<1x8x8xf32>, vector<1x8x8xf32>, vector<1x8x8xf32>, vector<1x8x8xf32> -> vector<4x8x8xf32>
    %18 = vector.extract_strided_slice %5 {offsets = [0, 0], sizes = [8, 8], strides = [1, 1]} : vector<8x32xf32> to vector<8x8xf32>
    %19 = vector.extract_strided_slice %5 {offsets = [0, 8], sizes = [8, 8], strides = [1, 1]} : vector<8x32xf32> to vector<8x8xf32>
    %20 = vector.extract_strided_slice %5 {offsets = [0, 16], sizes = [8, 8], strides = [1, 1]} : vector<8x32xf32> to vector<8x8xf32>
    %21 = vector.extract_strided_slice %5 {offsets = [0, 24], sizes = [8, 8], strides = [1, 1]} : vector<8x32xf32> to vector<8x8xf32>
    %22 = vector.shape_cast %18 : vector<8x8xf32> to vector<1x8x8xf32>
    %23 = vector.shape_cast %19 : vector<8x8xf32> to vector<1x8x8xf32>
    %24 = vector.shape_cast %20 : vector<8x8xf32> to vector<1x8x8xf32>
    %25 = vector.shape_cast %21 : vector<8x8xf32> to vector<1x8x8xf32>
    %26 = tpu.concatenate %22, %23, %24, %25 in 0 : vector<1x8x8xf32>, vector<1x8x8xf32>, vector<1x8x8xf32>, vector<1x8x8xf32> -> vector<4x8x8xf32>
    %27 = vector.extract_strided_slice %6 {offsets = [0, 0], sizes = [8, 8], strides = [1, 1]} : vector<8x32xf32> to vector<8x8xf32>
    %28 = vector.extract_strided_slice %6 {offsets = [0, 8], sizes = [8, 8], strides = [1, 1]} : vector<8x32xf32> to vector<8x8xf32>
    %29 = vector.extract_strided_slice %6 {offsets = [0, 16], sizes = [8, 8], strides = [1, 1]} : vector<8x32xf32> to vector<8x8xf32>
    %30 = vector.extract_strided_slice %6 {offsets = [0, 24], sizes = [8, 8], strides = [1, 1]} : vector<8x32xf32> to vector<8x8xf32>
    %31 = vector.shape_cast %27 : vector<8x8xf32> to vector<1x8x8xf32>
    %32 = vector.shape_cast %28 : vector<8x8xf32> to vector<1x8x8xf32>
    %33 = vector.shape_cast %29 : vector<8x8xf32> to vector<1x8x8xf32>
    %34 = vector.shape_cast %30 : vector<8x8xf32> to vector<1x8x8xf32>
    %35 = tpu.concatenate %31, %32, %33, %34 in 0 : vector<1x8x8xf32>, vector<1x8x8xf32>, vector<1x8x8xf32>, vector<1x8x8xf32> -> vector<4x8x8xf32>
    "tpu.trace_start"() <{level = 10 : i32, message = "hqd,hkd->hqk"}> : () -> ()
    %cst_5 = arith.constant dense<0.000000e+00> : vector<4x8x8xf32>
    %36 = tpu.matmul %17, %26, %cst_5 {dimension_numbers = #tpu.dot_dimension_numbers<[2], [2], [1], [1], [0, 0, 0, 1, 1, 1], [0], [0]>} : vector<4x8x8xf32>, vector<4x8x8xf32>, vector<4x8x8xf32> -> vector<4x8x8xf32>
    "tpu.trace_stop"() : () -> ()
    %cst_6 = arith.constant dense<0xFF800000> : vector<4x8xf32>
    %37 = vector.multi_reduction <maximumf>, %36, %cst_6 [2] : vector<4x8x8xf32> to vector<4x8xf32>
    %38 = vector.shape_cast %37 : vector<4x8xf32> to vector<4x8x1xf32>
    %39 = vector.broadcast %38 : vector<4x8x1xf32> to vector<4x8x8xf32>
    %40 = arith.subf %36, %39 : vector<4x8x8xf32>
    %41 = math.exp %40 : vector<4x8x8xf32>
    %cst_7 = arith.constant dense<0.000000e+00> : vector<4x8xf32>
    %42 = vector.multi_reduction <add>, %41, %cst_7 [2] : vector<4x8x8xf32> to vector<4x8xf32>
    %43 = vector.shape_cast %42 : vector<4x8xf32> to vector<4x8x1xf32>
    %44 = tpu.reciprocal %43 {approx = true} : vector<4x8x1xf32> -> vector<4x8x1xf32>
    %45 = vector.broadcast %44 : vector<4x8x1xf32> to vector<4x8x8xf32>
    %46 = arith.mulf %41, %45 : vector<4x8x8xf32>
    "tpu.trace_start"() <{level = 10 : i32, message = "hqk,hkd->hqd"}> : () -> ()
    %cst_8 = arith.constant dense<0.000000e+00> : vector<4x8x8xf32>
    %47 = tpu.matmul %46, %35, %cst_8 {dimension_numbers = #tpu.dot_dimension_numbers<[2], [1], [1], [2], [0, 0, 0, 1, 1, 2], [0], [0]>} : vector<4x8x8xf32>, vector<4x8x8xf32>, vector<4x8x8xf32> -> vector<4x8x8xf32>
    "tpu.trace_stop"() : () -> ()
    %48 = vector.extract_strided_slice %47 {offsets = [0, 0, 0], sizes = [1, 8, 8], strides = [1, 1, 1]} : vector<4x8x8xf32> to vector<1x8x8xf32>
    %49 = vector.shape_cast %48 : vector<1x8x8xf32> to vector<8x8xf32>
    %50 = vector.extract_strided_slice %47 {offsets = [1, 0, 0], sizes = [1, 8, 8], strides = [1, 1, 1]} : vector<4x8x8xf32> to vector<1x8x8xf32>
    %51 = vector.shape_cast %50 : vector<1x8x8xf32> to vector<8x8xf32>
    %52 = vector.extract_strided_slice %47 {offsets = [2, 0, 0], sizes = [1, 8, 8], strides = [1, 1, 1]} : vector<4x8x8xf32> to vector<1x8x8xf32>
    %53 = vector.shape_cast %52 : vector<1x8x8xf32> to vector<8x8xf32>
    %54 = vector.extract_strided_slice %47 {offsets = [3, 0, 0], sizes = [1, 8, 8], strides = [1, 1, 1]} : vector<4x8x8xf32> to vector<1x8x8xf32>
    %55 = vector.shape_cast %54 : vector<1x8x8xf32> to vector<8x8xf32>
    %56 = tpu.concatenate %49, %51, %53, %55 in 1 : vector<8x8xf32>, vector<8x8xf32>, vector<8x8xf32>, vector<8x8xf32> -> vector<8x32xf32>
    %c0_9 = arith.constant 0 : index
    %c0_10 = arith.constant 0 : index
    %57 = vector.load %arg4[%c0_9, %c0_10] : memref<32x32xf32, #tpu.memory_space<vmem>>, vector<32x32xf32>
    %cst_11 = arith.constant dense<0.000000e+00> : vector<8x32xf32>
    %58 = tpu.matmul %56, %57, %cst_11 {dimension_numbers = #tpu.dot_dimension_numbers<[1], [0], [0], [1], [0, 0, 1, 1], [], []>} : vector<8x32xf32>, vector<32x32xf32>, vector<8x32xf32> -> vector<8x32xf32>
    %c0_12 = arith.constant 0 : index
    %c0_13 = arith.constant 0 : index
    %59 = vector.load %arg5[%c0_12, %c0_13] : memref<1x32xf32, #tpu.memory_space<vmem>>, vector<1x32xf32>
    %60 = vector.broadcast %59 : vector<1x32xf32> to vector<8x32xf32>
    %61 = arith.addf %58, %60 : vector<8x32xf32>
    %c0_14 = arith.constant 0 : index
    %c0_15 = arith.constant 0 : index
    %c0_16 = arith.constant 0 : index
    %62 = vector.load %arg6[%c0_14, %c0_15, %c0_16] : memref<1x8x32xf32, #tpu.memory_space<vmem>>, vector<1x8x32xf32>
    %63 = vector.shape_cast %62 : vector<1x8x32xf32> to vector<8x32xf32>
    %64 = vector.shape_cast %61 : vector<8x32xf32> to vector<1x8x32xf32>
    tpu.vector_store %arg6[%c0_14, %c0_15, %c0_16], %64 {strides = array<i32>} : memref<1x8x32xf32, #tpu.memory_space<vmem>>, vector<1x8x32xf32>,
    return
  }
  func.func @transform_0(%arg0: i32, %arg1: i32) -> (i32, i32, i32) {
    %c0_i32 = arith.constant 0 : i32
    %c0_i32_0 = arith.constant 0 : i32
    %c0_i32_1 = arith.constant 0 : i32
    return %arg0, %c0_i32, %c0_i32_0 : i32, i32, i32
  }
  func.func @transform_1(%arg0: i32, %arg1: i32) -> (i32, i32) {
    %c0_i32 = arith.constant 0 : i32
    %c0_i32_0 = arith.constant 0 : i32
    %c0_i32_1 = arith.constant 0 : i32
    return %c0_i32, %c0_i32_0 : i32, i32
  }
  func.func @transform_2(%arg0: i32, %arg1: i32) -> (i32, i32) {
    %c0_i32 = arith.constant 0 : i32
    %c0_i32_0 = arith.constant 0 : i32
    %c0_i32_1 = arith.constant 0 : i32
    return %c0_i32, %c0_i32_0 : i32, i32
  }
  func.func @transform_3(%arg0: i32, %arg1: i32) -> (i32, i32) {
    %c0_i32 = arith.constant 0 : i32
    %c0_i32_0 = arith.constant 0 : i32
    %c0_i32_1 = arith.constant 0 : i32
    return %c0_i32, %c0_i32_0 : i32, i32
  }
  func.func @transform_4(%arg0: i32, %arg1: i32) -> (i32, i32, i32) {
    %c0_i32 = arith.constant 0 : i32
    %c0_i32_0 = arith.constant 0 : i32
    return %arg0, %arg1, %c0_i32 : i32, i32, i32
  }
}

</mosaic_0001>

<bundles_post_ra>
// kernel: tpu_custom_call.1
= control target key start
LH: loop header
LB: loop body
LE: loop exit
PB: predicated region body
PF: predicated region fallthrough
CT: control target
= control target key end

     0   :  { %9 = vsyncpa [#allocation3], 0  ;;  %s2097_s0 = inlined_call_operand.hbm [shape: f32[2,8,32], index: 0, kind: input, shape index: {}]   ;;  %s2098_s1 = inlined_call_operand.hbm [shape: f32[32,96], index: 1, kind: input, shape index: {}]   ;;  %s2099_s2 = inlined_call_operand.hbm [shape: f32[32,32], index: 2, kind: input, shape index: {}]   ;;  %s2100_s3 = inlined_call_operand.hbm [shape: f32[1,32], index: 3, kind: input, shape index: {}]   ;;  %s2101_s4 = inlined_call_operand.hbm [shape: f32[2,8,32], index: 4, kind: output, shape index: {}]  }
   0x1   :  { %11 = vsyncpa [#allocation3 + $0x1], 0 }
   0x2   :  { %12 = vsyncpa [#allocation6], 0 }
   0x3   :  { %13 = vsyncpa [#allocation9], 0 }
   0x4   :  { %14 = vsyncpa [#allocation4], 0 }
   0x5   :  { %16 = vsyncpa [#allocation4 + $0x1], 0  ;;  %s1746_s15 = smov 0   ;;  %s1748_s16 = smov 0  }
   0x6   :  { %s1750_s17 = smov 0   ;;  %s1752_s18 = smov 0  }
   0x7   :  { %s1754_s19 = smov 0   ;;  %s1756_s20 = smov 0  }
   0x8 LB: > { %s1241_s21 = sadd.s32 4294967295, %s1701_s20   ;;  %s1242_s22 = sadd.s32 4294967294, %s1701_s20   ;;  %s1701_s20 = sphi %s1756_s20, %s22_s20   ;;  %s1697_s19 = sphi %s1754_s19, %s2128_s19   ;;  %s1693_s18 = sphi %s1752_s18, %s2127_s18   ;;  %s1689_s17 = sphi %s1750_s17, %s2126_s17   ;;  %s1685_s16 = sphi %s1748_s16, %s2125_s16   ;;  %s1681_s15 = sphi %s1746_s15, %s2124_s15  }
   0x9   : > { %p54_p0 = scmp.ne.s32.totalorder %s1685_s16, %s1681_s15  ;;  %p1780_p1 = scmp.eq.s32.totalorder %s1241_s21, 0 }
   0xa   : > { %p1784_p2 = scmp.eq.s32.totalorder %s1241_s21, 1  ;;  %p149_p3 = scmp.eq.s32.totalorder %s1242_s22, 1 }
   0xb   : > { %s2107_s23 = scalar_select %p1780_p1, 1, 0 }
   0xc   : > { %s2108_s24 = scalar_select %p1784_p2, 1, 0 }
   0xd   : > { %p1790_p4 = por %p1780_p1, %p54_p0  ;;  %p1243_p5 = scmp.ge.s32.totalorder %s1701_s20, 1 }
   0xe   : > { %p1795_p6 = por %p149_p3, %p54_p0  ;;  %p156_p7 = scmp.lt.s32.totalorder %s1701_s20, 3 }
   0xf   : > { %s2109_s25 = scalar_select %p1790_p4, 1, 0 }
  0x10   : > { %s2110_s26 = scalar_select %p1795_p6, 1, 0 }
  0x11   : > { %p1800_p8 = pnand %p1243_p5, %p156_p7  ;;  %s1703_s28 = smov [#allocation5]  }
  0x12   : > { %2111 = sst [smem:[#allocation15_spill]] %s2110_s26  ;;  %s168_s29 = sshll.u32 %s1703_s28, 4  ;;  %s1804_s29 = int_to_ptr.vmem [resolvable:$true] %s168_s29 }
  0x13   : > { %s2112_s27 = scalar_select %p1800_p8, 1, 0 }
  0x14   : > { %p1391_p9 = pneg %p1800_p8  ;;  %s1704_s5 = smov [#allocation7]  }
  0x15   : > { %s181_s6 = sshll.u32 %s1704_s5, 4  ;;  %s1705_s7 = smov [#allocation8]   ;;  %s1815_s6 = int_to_ptr.vmem [resolvable:$true] %s181_s6 }
  0x16   : > { %p1811_p11 = pnand %p1391_p9, %p1780_p1  ;;  %s1817_s8 = sshll.u32 %s1705_s7, 4  ;;  %s196_s8 = int_to_ptr.vmem [resolvable:$true] %s1817_s8 }
  0x17   : > { %s1497_s11 = scalar_lea.hbm %s2098_s1, 512 }
  0x18   : > { %p1498_p12 = scmp.ne.s32.totalorder %s2098_s1, %s1497_s11  ;;  %p1827_p13 = pneg %p1811_p11 }
  0x19   : > { %p1504_p5 = scmp.lt.u32.totalorder %s1497_s11, %s2098_s1 }
  0x1a   : > { %p1500_p0 = pnand %p1827_p13, %p1498_p12 }
  0x1c   : > { %p1501_p3 = pneg %p1500_p0 }
  0x1e   : > { %p1506_p7 = pnand %p1504_p5, %p1501_p3 }
  0x20   : > { %1509 = shalt.err (!%p1506_p7)
}
  0x21   : > { %s1510_s28 = scalar_lea.vmem %s1804_s29, 512  ;;  %p1518_p1 = scmp.lt.s32.totalorder %s1804_s29, %s1804_s29 }
  0x22   : > { %p1511_p9 = scmp.ne.s32.totalorder %s1804_s29, %s1510_s28  ;;  %p1519_p4 = scmp.lt.s32.totalorder %s1510_s28, %s1510_s28 }
  0x24   : > { %p1513_p10 = pnand %p1511_p9, %p1827_p13  ;;  %p1520_p12 = por %p1519_p4, %p1518_p1 }
  0x26   : > { %p1514_p6 = pneg %p1513_p10 }
  0x28   : > { %p1521_p0 = pnand %p1520_p12, %p1514_p6 }
  0x2a   : > { %1524 = shalt.err (!%p1521_p0)
}
  0x2b   : > { %s1706_s5 = smov 128   ;;  %s1707_s7 = smov 8  }
  0x2c   : > { %1394 = dma.hbm_to_vmem [thread:$0]  (!%p1811_p11), %s2098_s1, 512, %s1804_s29, [#allocation6], %s1706_s5, %s1706_s5, %s1707_s7  }
  0x2d   : > { %s1525_s13 = scalar_lea.hbm %s2099_s2, 512 }
  0x2e   : > { %p1526_p1 = scmp.ne.s32.totalorder %s2099_s2, %s1525_s13  ;;  %p1532_p10 = scmp.lt.u32.totalorder %s1525_s13, %s2099_s2 }
  0x30   : > { %p1528_p4 = pnand %p1526_p1, %p1827_p13 }
  0x32   : > { %p1529_p6 = pneg %p1528_p4 }
  0x34   : > { %p1534_p3 = pnand %p1532_p10, %p1529_p6 }
  0x36   : > { %1537 = shalt.err (!%p1534_p3)
}
  0x37   : > { %s1538_s29 = scalar_lea.vmem %s1815_s6, 512  ;;  %p1546_p12 = scmp.lt.s32.totalorder %s1815_s6, %s1815_s6 }
  0x38   : > { %p1539_p5 = scmp.ne.s32.totalorder %s1815_s6, %s1538_s29  ;;  %p1547_p0 = scmp.lt.s32.totalorder %s1538_s29, %s1538_s29 }
  0x3a   : > { %p1541_p7 = pnand %p1539_p5, %p1827_p13  ;;  %p1548_p1 = por %p1547_p0, %p1546_p12 }
  0x3c   : > { %p1542_p9 = pneg %p1541_p7 }
  0x3e   : > { %p1549_p4 = pnand %p1548_p1, %p1542_p9 }
  0x40   : > { %1552 = shalt.err (!%p1549_p4)
}
  0x41   : > { %1397 = dma.hbm_to_vmem [thread:$0]  (!%p1811_p11), %s2099_s2, 512, %s1815_s6, [#allocation6], %s1706_s5, %s1706_s5, %s1707_s7  }
  0x42   : > { %s1553_s12 = scalar_lea.hbm %s2100_s3, 16 }
  0x43   : > { %p1554_p6 = scmp.ne.s32.totalorder %s2100_s3, %s1553_s12  ;;  %p1560_p5 = scmp.lt.u32.totalorder %s1553_s12, %s2100_s3 }
  0x45   : > { %p1556_p10 = pnand %p1554_p6, %p1827_p13 }
  0x47   : > { %p1557_p3 = pneg %p1556_p10 }
  0x49   : > { %p1562_p7 = pnand %p1560_p5, %p1557_p3 }
  0x4b   : > { %1565 = shalt.err (!%p1562_p7)
}
  0x4c   : > { %s1566_s29 = scalar_lea.vmem %s196_s8, 16  ;;  %s1573_s6 = scalar_lea.vmem %s196_s8, 32 }
  0x4d   : > { %p1567_p9 = scmp.ne.s32.totalorder %s196_s8, %s1566_s29  ;;  %p1574_p1 = scmp.lt.s32.totalorder %s196_s8, %s196_s8 }
  0x4e   : > { %p1575_p4 = scmp.lt.s32.totalorder %s1573_s6, %s1566_s29 }
  0x4f   : > { %p1569_p12 = pnand %p1567_p9, %p1827_p13 }
  0x50   : > { %p1576_p8 = por %p1575_p4, %p1574_p1 }
  0x51   : > { %p1570_p0 = pneg %p1569_p12 }
  0x53   : > { %p1577_p2 = pnand %p1576_p8, %p1570_p0 }
  0x55   : > { %1580 = shalt.err (!%p1577_p2)
}
  0x56   : > { %1400 = dma.hbm_to_vmem [thread:$0]  (!%p1811_p11), %s2100_s3, 16, %s196_s8, [#allocation9]  }
  0x57   : > { %s41_s14 = sadd.s32 1, %s1689_s17  ;;  %s34_s26 = sadd.s32 1, %s1697_s19 }
  0x58   : > { %p48_p2 = scmp.ne.s32.totalorder %s1689_s17, %s1685_s16  ;;  %p36_p8 = scmp.ge.s32.totalorder %s34_s26, 2 }
  0x59   : > { %p49_p13 = scmp.eq.s32.totalorder %s1701_s20, 0  ;;  %p2115_p6 = scmp.ne.s32.totalorder %s2108_s24, 0 }
  0x5a   : > { %p1412_p3 = scmp.lt.s32.totalorder %s1701_s20, 2  ;;  %s2130_s26 = smov (%p36_p8, %s34_s26), 0 }
  0x5b   : > { %p1897_p10 = por %p2115_p6, %p48_p2  ;;  %p50_p5 = por %p49_p13, %p48_p2 }
  0x5c   : > { %s206_s9 = sand.u32 1, %s1689_s17   ;;  %s38_s10 = ssub.s32 %s1697_s19, %s2130_s26 }
  0x5d   : > { %p39_p7 = scmp.eq.s32.totalorder %s38_s10, 0  ;;  %s1248_s8 = sshll.u32 %s206_s9, 3 }
  0x5e   : > { %s1249_s11 = sshll.u32 %s1697_s19, 7  ;;  %s210_s22 = scalar_lea.vmem [#allocation2], %s1248_s8 }
  0x5f   : > { %s1909_s12 = scalar_select %p39_p7, %s1689_s17, %s41_s14  }
  0x60   : > { %s1914_s24 = scalar_lea.hbm %s2097_s0, %s1249_s11  ;;  %s217_s28 = sshll.u32 %s210_s22, 4  ;;  %s1916_s28 = int_to_ptr.vmem [resolvable:$true] %s217_s28 }
  0x61   : > { %p1920_p11 = pnand %p1412_p3, %p50_p5  ;;  %s207_s6 = scalar_lea.sflag [#allocation3], %s206_s9 }
  0x62   : > { %s1581_s5 = scalar_lea.hbm %s1914_s24, 128  ;;  %s1586_s10 = scalar_lea.hbm %s2097_s0, 256 }
  0x63   : > { %p1582_p9 = scmp.ne.s32.totalorder %s1914_s24, %s1581_s5  ;;  %p1583_p12 = pneg %p1920_p11 }
  0x64   : > { %p1587_p4 = scmp.lt.u32.totalorder %s1914_s24, %s2097_s0  ;;  %p1588_p2 = scmp.lt.u32.totalorder %s1586_s10, %s1581_s5 }
  0x65   : > { %p1584_p0 = pnand %p1583_p12, %p1582_p9  ;;  %p1590_p13 = scmp.lt.u32.totalorder %s1581_s5, %s1914_s24 }
  0x66   : > { %p1589_p8 = por %p1588_p2, %p1587_p4 }
  0x67   : > { %p1585_p1 = pneg %p1584_p0 }
  0x68   : > { %p1591_p6 = por %p1590_p13, %p1589_p8 }
  0x6a   : > { %p1592_p3 = pnand %p1591_p6, %p1585_p1 }
  0x6c   : > { %1595 = shalt.err (!%p1592_p3)
}
  0x6d   : > { %s1596_s9 = scalar_lea.vmem %s1916_s28, 128  ;;  %s1708_s13 = smov [#allocation2]  }
  0x6e   : > { %p1597_p5 = scmp.ne.s32.totalorder %s1916_s28, %s1596_s9  ;;  %s1601_s21 = sshll.u32 %s1708_s13, 4  ;;  %s1602_s21 = int_to_ptr.vmem [resolvable:$false] %s1601_s21 }
  0x6f   : > { %s1603_s22 = scalar_lea.vmem %s1602_s21, 256  ;;  %p1604_p0 = scmp.lt.s32.totalorder %s1916_s28, %s1602_s21 }
  0x70   : > { %p1599_p7 = pnand %p1597_p5, %p1583_p12  ;;  %p1605_p4 = scmp.lt.s32.totalorder %s1603_s22, %s1596_s9 }
  0x72   : > { %p1600_p9 = pneg %p1599_p7  ;;  %p1606_p2 = por %p1605_p4, %p1604_p0 }
  0x74   : > { %p1607_p8 = pnand %p1606_p2, %p1600_p9 }
  0x76   : > { %1610 = shalt.err (!%p1607_p8)
}
  0x77   : > { %1404 = dma.hbm_to_vmem [thread:$0]  (!%p1920_p11), %s1914_s24, 128, %s1916_s28, %s207_s6  }
  0x78   : > { %p2118_p1 = scmp.ne.s32.totalorder %s2112_s27, 0 }
  0x79   : > { %s1952_s5 = sand.u32 (!%p2118_p1), 1, %s1685_s16   ;;  %p2119_p12 = scmp.ne.s32.totalorder (!%p2118_p1), %s2109_s25, 0 }
  0x7a   : > { %226 = sbr.rel (%p2118_p1) target bundleno = 1681 (0x691), region = 36  ;;  %s1251_s7 = sshll.u32 (!%p2118_p1), %s1952_s5, 3 }
  0x7b   : > { %s229_s14 = scalar_lea.sflag (!%p2118_p1), [#allocation3], %s1952_s5  ;;  %s232_s10 = scalar_lea.vmem (!%p2118_p1), [#allocation2], %s1251_s7 }
  0x81   : > { %1664 = dma.done.wait (%p2119_p12), %s229_s14, 128  }
  0x82   : > { %1666 = vsyncadd (%p2119_p12), %s229_s14, 4294967168  ;;  %p2120_p11 = scmp.ne.s32.totalorder %s2107_s23, 0 }
  0x84   : > { %1668 = dma.done.wait (%p2120_p11), [#allocation6], 1024  }
  0x85   : > { %1670 = vsyncadd (%p2120_p11), [#allocation6], 4294966272 }
  0x86   : > { %1672 = dma.done.wait (%p2120_p11), [#allocation9], 16  }
  0x87   : > { %1674 = vsyncadd (%p2120_p11), [#allocation9], 4294967280  ;;  %v1709_v0 = vmov 0.0|0.0   ;;  %vm1710_vm0 = vmmov 0   ;;  %v1711_v1 = vmov 0.0   ;;  %v270_v2 = vld [vmem:[#allocation5] sm:$0xff] }
  0x88   : > { %1363 = vmatprep.subr.bf16.mxu0 %v1709_v0  ;;  %1309 = vmatprep.mubr.msk.f32.mxu0 %vm1710_vm0, %v1711_v1  ;;  %v271_v3 = vld [vmem:[#allocation5 + $0x8] sm:$0xff]  ;;  %v272_v4 = vld [vmem:[#allocation5 + $0x10] sm:$0xff]  ;;  %v273_v6 = vld [vmem:[#allocation5 + $0x18] sm:$0xff]  ;;  %vm274_vm1 = vcmask 261120   ;;  %s1712_s23 = smov 104   ;;  %s1713_s25 = smov 120  }
  0x89   : > { %1312 = vmatprep.subr.mxu1 %v1711_v1  ;;  %1314 = vmatprep.mubr.msk.f32.mxu1 %vm1710_vm0, %v1711_v1  ;;  %v1364_v5 = vpack.c.bf16 %v271_v3, %v270_v2  ;;  %v1367_v7 = vpack.c.bf16 %v273_v6, %v272_v4  ;;  %v269_v8 = vld [vmem:[%s232_s10] sm:$0xff]  ;;  %s1714_s27 = smov 96   ;;  %s1715_s24 = smov 112   ;;  %vm365_vm2 = vcmask 64512   ;;  %vm1029_vm3 = vcmask 130048  }
  0x8a   : > { %s1716_s28 = smov 64   ;;  %s1717_s29 = smov 8   ;;  %vm1031_vm4 = vcmask 195584  }
  0x8b   : > { %1365 = vmatpush3.bf16.msra.mxu0 %v1364_v5  ;;  %s1718_s6 = smov 16   ;;  %s1719_s8 = smov 24  }
  0x8c   : > { %1366 = vmatprep.subr.bf16.mxu0 %v1709_v0  ;;  %s1272_s11 = sshll.u32 %s1693_s18, 7  ;;  %s268_s9 = scalar_lea.vmem [#allocation10], %s1251_s7 }
  0x8d   : > { %s1133_s13 = sshll.u32 %s268_s9, 4  ;;  %s2047_s14 = scalar_lea.hbm %s2101_s4, %s1272_s11  ;;  %s2049_s13 = int_to_ptr.vmem [resolvable:$true] %s1133_s13 }
  0x8e   : > { %s1119_s10 = scalar_lea.sflag [#allocation4], %s1952_s5  ;;  %s1611_s18 = scalar_lea.vmem %s2049_s13, 128 }
  0x8f   : > { %1368 = vmatpush3.bf16.msra.mxu0 %v1367_v7  ;;  %p1612_p13 = scmp.ne.s32.totalorder %s2049_s13, %s1611_s18  ;;  %s1720_s7 = smov [#allocation10]  }
  0x90   : > { %1332 = vmatprep.subr.mxu0 %v1711_v1 }
  0x91   : > { %p1613_p6 = pnand %p1612_p13, %p1897_p10 }
  0x92   : > { %1310 = vmatmul.mubr.msk.f32.vlgmr.msra.gmra.mrb[0].mxu0 %vm274_vm1, %v269_v8 }
  0x93   : > { %1334 = vmatprep.mubr.msk.f32.mxu0 %vm1710_vm0, %v1711_v1  ;;  %p1614_p3 = pneg %p1613_p6 }
 0x165   : > { %v344_v9 = vpop.f32.mrb[0].mxu0 }
 0x166   : > { %361 = vrot.lane.b32.xlu1 %v344_v9, %s1712_s23  ;;  %357 = vrot.lane.b32.xlu0 %v344_v9, %s1713_s25  ;;  %v1311_v10 = vpop.f32.mrb[1].mxu0  ;;  %v348_v11 = vmul.f32 0.35355338, %v344_v9 }
 0x167   : > { %v1033_v10 = vld [vmem:[#allocation7] sm:$0xff] }
 0x16a   : > { %363 = vrot.lane.b32.xlu1 %v344_v9, %s1714_s27  ;;  %359 = vrot.lane.b32.xlu0 %v344_v9, %s1715_s24 }
 0x16e   : > { %350 = vrot.lane.b32.xlu1 %v348_v11, %s1713_s25 }
 0x172   : > { %352 = vrot.lane.b32.xlu1 %v348_v11, %s1715_s24 }
 0x176   : > { %354 = vrot.lane.b32.xlu1 %v348_v11, %s1712_s23  ;;  %s1615_s23 = sshll.u32 %s1720_s7, 4  ;;  %s1616_s23 = int_to_ptr.vmem [resolvable:$false] %s1615_s23 }
 0x177   : > { %s1617_s25 = scalar_lea.vmem %s1616_s23, 256  ;;  %p1618_p5 = scmp.lt.s32.totalorder %s2049_s13, %s1616_s23 }
 0x178   : > { %p1619_p7 = scmp.lt.s32.totalorder %s1617_s25, %s1611_s18 }
 0x17a   : > { %p1620_p9 = por %p1619_p7, %p1618_p5 }
 0x17c   : > { %p1621_p0 = pnand %p1620_p9, %p1614_p3 }
 0x1d8   : > { %v1981_v12 = vpop.permute.xlu1 %361  ;;  %v1983_v13 = vpop.permute.xlu0 %357 }
 0x1d9   : > { %440 = vrot.lane.b32.xlu0 %v1983_v13, %s1714_s27 }
 0x1dc   : > { %v364_v14 = vpop.permute.xlu1 %363  ;;  %v1986_v15 = vpop.permute.xlu0 %359 }
 0x1dd   : > { %1313 = vmatpush3.xpose.msk.msra.mxu1 %vm365_vm2, %v364_v14  ;;  %516 = vrot.lane.b32.xlu0 %v1986_v15, %s1714_s27  ;;  %v1036_v14 = vld [vmem:[#allocation7 + $0x18] sm:$0xff] }
 0x1de   : > { %1317 = vmatprep.subr.mxu1 %v1711_v1 }
 0x1e0   : > { %1315 = vmatmul.mubr.msk.f32.vlgmr.msra.gmra.mrb[0].mxu1 %vm365_vm2, %v348_v11  ;;  %v351_v16 = vpop.permute.xlu1 %350  ;;  %v1034_v11 = vld [vmem:[#allocation7 + $0x8] sm:$0xff] }
 0x1e1   : > { %592 = vrot.lane.b32.xlu0 %v1981_v12, %s1714_s27  ;;  %1319 = vmatprep.mubr.msk.f32.mxu1 %vm1710_vm0, %v1711_v1 }
 0x1e4   : > { %v353_v19 = vpop.permute.xlu1 %352 }
 0x1e8   : > { %v355_v21 = vpop.permute.xlu1 %354 }
 0x24b   : > { %v441_v17 = vpop.permute.xlu0 %440 }
 0x24c   : > { %1318 = vmatpush3.xpose.msk.msra.mxu1 %vm365_vm2, %v441_v17 }
 0x24d   : > { %1322 = vmatprep.subr.mxu1 %v1711_v1 }
 0x24f   : > { %v517_v18 = vpop.permute.xlu0 %516  ;;  %1320 = vmatmul.mubr.msk.f32.vlgmr.msra.gmra.mrb[2].mxu1 %vm365_vm2, %v351_v16 }
 0x250   : > { %1323 = vmatpush3.xpose.msk.msra.mxu1 %vm365_vm2, %v517_v18  ;;  %1324 = vmatprep.mubr.msk.f32.mxu1 %vm1710_vm0, %v1711_v1 }
 0x251   : > { %1327 = vmatprep.subr.mxu1 %v1711_v1 }
 0x253   : > { %v593_v20 = vpop.permute.xlu0 %592  ;;  %1325 = vmatmul.mubr.msk.f32.vlgmr.msra.gmra.mrb[4].mxu1 %vm365_vm2, %v353_v19 }
 0x254   : > { %1328 = vmatpush3.xpose.msk.msra.mxu1 %vm365_vm2, %v593_v20  ;;  %1329 = vmatprep.mubr.msk.f32.mxu1 %vm1710_vm0, %v1711_v1 }
 0x255   : > { %1337 = vmatprep.subr.mxu1 %v1711_v1 }
 0x257   : > { %1330 = vmatmul.mubr.msk.f32.vlgmr.msra.gmra.mrb[6].mxu1 %vm365_vm2, %v355_v21 }
 0x258   : > { %1339 = vmatprep.mubr.msk.f32.mxu1 %vm1710_vm0, %v1711_v1 }
 0x2b3   : > { %v436_v22 = vpop.f32.mrb[0].mxu1 }
 0x2b4   : > { %v1316_v23 = vpop.f32.mrb[1].mxu1  ;;  %v668_v24 = vsel %vm365_vm2, %v436_v22, -inf }
 0x2b5   : > { %669 = vmax.xlane.f32.xlu0 %v668_v24 }
 0x322   : > { %v512_v25 = vpop.f32.mrb[2].mxu1 }
 0x323   : > { %v1321_v26 = vpop.f32.mrb[3].mxu1  ;;  %v671_v27 = vsel %vm365_vm2, %v512_v25, -inf }
 0x324   : > { %672 = vmax.xlane.f32.xlu1 %v671_v27  ;;  %v1269_v26 = vld [vmem:[#allocation8] ss:$0 sm:$0xff] }
 0x326   : > { %v588_v28 = vpop.f32.mrb[4].mxu1 }
 0x327   : > { %v1326_v29 = vpop.f32.mrb[5].mxu1  ;;  %v674_v30 = vsel %vm365_vm2, %v588_v28, -inf }
 0x328   : > { %675 = vmax.xlane.f32.xlu0 %v674_v30 }
 0x32a   : > { %v664_v31 = vpop.f32.mrb[6].mxu1 }
 0x32b   : > { %v1331_v32 = vpop.f32.mrb[7].mxu1  ;;  %v677_v33 = vsel %vm365_vm2, %v664_v31, -inf }
 0x32c   : > { %678 = vmax.xlane.f32.xlu0 %v677_v33 }
 0x335   : > { %712 = vrot.lane.b32.xlu1 %v344_v9, %s1716_s28 }
 0x342   : > { %v670_v34 = vpop.xlane.xlu0 %669 }
 0x343   : > { %v680_v35 = vsub.f32 %v436_v22, %v670_v34 }
 0x345   : > { %v684_v36 = vmul.f32 1.442695, %v680_v35 }
 0x347   : > { %1481 = vpow2.f32 %v684_v36 }
 0x351   : > { %v1482_v37 = vpop.eup %1481 }
 0x352   : > { %v692_v38 = vsel %vm365_vm2, %v1482_v37, 0.0 }
 0x359   : > { %693 = vadd.xlane.f32.xlu1 %v692_v38 }
 0x3b1   : > { %v673_v39 = vpop.xlane.xlu1 %672 }
 0x3b2   : > { %v681_v40 = vsub.f32 %v512_v25, %v673_v39 }
 0x3b4   : > { %v686_v41 = vmul.f32 1.442695, %v681_v40 }
 0x3b5   : > { %v713_v42 = vpop.permute.xlu1 %712  ;;  %v676_v43 = vpop.xlane.xlu0 %675 }
 0x3b6   : > { %1483 = vpow2.f32 %v686_v41  ;;  %v682_v44 = vsub.f32 %v588_v28, %v676_v43  ;;  %1333 = vmatpush3.msra.mxu0 %v713_v42 }
 0x3b7   : > { %1342 = vmatprep.subr.mxu0 %v1711_v1 }
 0x3b8   : > { %v688_v45 = vmul.f32 1.442695, %v682_v44 }
 0x3b9   : > { %v679_v46 = vpop.xlane.xlu0 %678 }
 0x3ba   : > { %1485 = vpow2.f32 %v688_v45  ;;  %v683_v47 = vsub.f32 %v664_v31, %v679_v46 }
 0x3bc   : > { %v690_v48 = vmul.f32 1.442695, %v683_v47 }
 0x3be   : > { %1487 = vpow2.f32 %v690_v48 }
 0x3c0   : > { %v1484_v49 = vpop.eup %1483 }
 0x3c1   : > { %v695_v50 = vsel %vm365_vm2, %v1484_v49, 0.0 }
 0x3c2   : > { %696 = vadd.xlane.f32.xlu0 %v695_v50 }
 0x3c4   : > { %v1486_v51 = vpop.eup %1485 }
 0x3c5   : > { %v698_v52 = vsel %vm365_vm2, %v1486_v51, 0.0 }
 0x3c6   : > { %699 = vadd.xlane.f32.xlu1 %v698_v52 }
 0x3c8   : > { %v1488_v53 = vpop.eup %1487 }
 0x3c9   : > { %v701_v54 = vsel %vm365_vm2, %v1488_v53, 0.0 }
 0x3ca   : > { %702 = vadd.xlane.f32.xlu0 %v701_v54 }
 0x3d7   : > { %864 = vrot.lane.b32.xlu1 %v1986_v15, %s1716_s28 }
 0x3db   : > { %940 = vrot.lane.b32.xlu1 %v1981_v12, %s1716_s28  ;;  %v1370_v12 = vpack.c.bf16 %v1034_v11, %v1033_v10 }
 0x3e0   : > { %788 = vrot.lane.b32.xlu0 %v1983_v13, %s1716_s28  ;;  %v1035_v13 = vld [vmem:[#allocation7 + $0x10] sm:$0xff] }
 0x3e1   : > { %v1373_v15 = vpack.c.bf16 %v1036_v14, %v1035_v13 }
 0x3e6   : > { %v694_v55 = vpop.xlane.xlu1 %693 }
 0x3e7   : > { %1489 = vrcp.f32 %v694_v55 }
 0x3f1   : > { %v1490_v56 = vpop.eup %1489 }
 0x3f2   : > { %v708_v57 = vmul.f32 %v1490_v56, %v1482_v37 }
 0x3f4   : > { %1335 = vmatmul.mubr.msk.f32.vlgmr.msra.gmra.mrb[2].mxu0 %vm365_vm2, %v708_v57 }
 0x3f5   : > { %1344 = vmatprep.mubr.msk.f32.mxu0 %vm1710_vm0, %v1711_v1 }
 0x44f   : > { %v697_v58 = vpop.xlane.xlu0 %696 }
 0x450   : > { %1491 = vrcp.f32 %v697_v58 }
 0x453   : > { %v700_v59 = vpop.xlane.xlu1 %699 }
 0x454   : > { %1493 = vrcp.f32 %v700_v59 }
 0x457   : > { %v865_v60 = vpop.permute.xlu1 %864  ;;  %v703_v61 = vpop.xlane.xlu0 %702 }
 0x458   : > { %1495 = vrcp.f32 %v703_v61  ;;  %1343 = vmatpush3.msra.mxu0 %v865_v60 }
 0x459   : > { %1369 = vmatprep.subr.bf16.mxu0 %v1709_v0 }
 0x45a   : > { %v1492_v62 = vpop.eup %1491 }
 0x45b   : > { %v709_v63 = vmul.f32 %v1492_v62, %v1484_v49  ;;  %v789_v2 = vpop.permute.xlu0 %788  ;;  %v941_v3 = vpop.permute.xlu1 %940 }
 0x45c   : > { %1338 = vmatpush3.msra.mxu1 %v789_v2 }
 0x45d   : > { %1340 = vmatmul.mubr.msk.f32.vlgmr.msra.gmra.mrb[8].mxu1 %vm365_vm2, %v709_v63  ;;  %1347 = vmatprep.subr.mxu1 %v1711_v1 }
 0x45e   : > { %v1494_v4 = vpop.eup %1493  ;;  %1348 = vmatpush3.msra.mxu1 %v941_v3  ;;  %1349 = vmatprep.mubr.msk.f32.mxu1 %vm1710_vm0, %v1711_v1 }
 0x45f   : > { %v710_v5 = vmul.f32 %v1494_v4, %v1486_v51 }
 0x461   : > { %1345 = vmatmul.mubr.msk.f32.vlgmr.msra.gmra.mrb[4].mxu0 %vm365_vm2, %v710_v5 }
 0x462   : > { %v1496_v6 = vpop.eup %1495  ;;  %1360 = vmatprep.mubr.msk.f32.mxu0 %vm1710_vm0, %v1711_v1  ;;  %1371 = vmatpush3.bf16.msra.mxu0 %v1370_v12 }
 0x463   : > { %v711_v7 = vmul.f32 %v1496_v6, %v1488_v53  ;;  %1372 = vmatprep.subr.bf16.mxu0 %v1709_v0 }
 0x465   : > { %1350 = vmatmul.mubr.msk.f32.vlgmr.msra.gmra.mrb[10].mxu1 %vm365_vm2, %v711_v7 }
 0x466   : > { %1374 = vmatpush3.bf16.msra.mxu0 %v1373_v15 }
 0x4c7   : > { %v784_v8 = vpop.f32.mrb[2].mxu0 }
 0x4c8   : > { %v1336_v9 = vpop.f32.mrb[3].mxu0 }
 0x530   : > { %v860_v16 = vpop.f32.mrb[8].mxu1 }
 0x531   : > { %1017 = vrot.lane.b32.xlu0 %v860_v16, %s1717_s29  ;;  %v1341_v17 = vpop.f32.mrb[9].mxu1 }
 0x534   : > { %v936_v1 = vpop.f32.mrb[4].mxu0 }
 0x535   : > { %1021 = vrot.lane.b32.xlu1 %v936_v1, %s1718_s6  ;;  %v1346_v18 = vpop.f32.mrb[5].mxu0 }
 0x538   : > { %v1012_v19 = vpop.f32.mrb[10].mxu1 }
 0x539   : > { %1025 = vrot.lane.b32.xlu0 %v1012_v19, %s1719_s8  ;;  %v1351_v20 = vpop.f32.mrb[11].mxu1 }
 0x5a3   : > { %v1018_v21 = vpop.permute.xlu0 %1017 }
 0x5a4   : > { %v1028_v22 = vsel %vm365_vm2, %v784_v8, %v1018_v21 }
 0x5a7   : > { %v1022_v0 = vpop.permute.xlu1 %1021 }
 0x5a8   : > { %v1030_v23 = vsel %vm1029_vm3, %v1028_v22, %v1022_v0 }
 0x5ab   : > { %v1026_v24 = vpop.permute.xlu0 %1025 }
 0x5ac   : > { %v1032_v25 = vsel %vm1031_vm4, %v1030_v23, %v1026_v24 }
 0x5ad   : > { %1361 = vmatmul.mubr.msk.f32.vlgmr.msra.gmra.mrb[6].mxu0 %vm274_vm1, %v1032_v25 }
 0x680   : > { %v1113_v27 = vpop.f32.mrb[6].mxu0 }
 0x681   : > { %v1114_v28 = vadd.f32 %v1269_v26, %v1113_v27  ;;  %v1362_v29 = vpop.f32.mrb[7].mxu0 }
 0x683   : > { %1117 = vst.msk [vmem:[%s268_s9] sm:$0xff] %vm274_vm1, %v1114_v28 }
 0x684   : > { %1624 = shalt.err (!%p1621_p0)
}
 0x685   : > { %s1625_s5 = scalar_lea.hbm %s2047_s14, 128  ;;  %s1629_s28 = scalar_lea.hbm %s2101_s4, 256 }
 0x686   : > { %p1626_p4 = scmp.ne.s32.totalorder %s2047_s14, %s1625_s5  ;;  %p1630_p1 = scmp.lt.u32.totalorder %s2047_s14, %s2101_s4 }
 0x687   : > { %p1631_p12 = scmp.lt.u32.totalorder %s1629_s28, %s1625_s5  ;;  %p1633_p13 = scmp.lt.u32.totalorder %s1625_s5, %s2047_s14 }
 0x688   : > { %p1627_p2 = pnand %p1626_p4, %p1897_p10 }
 0x689   : > { %p1632_p11 = por %p1631_p12, %p1630_p1 }
 0x68a   : > { %p1628_p8 = pneg %p1627_p2 }
 0x68b   : > { %p1634_p6 = por %p1633_p13, %p1632_p11 }
 0x68d   : > { %p1635_p3 = pnand %p1634_p6, %p1628_p8 }
 0x68f   : > { %1638 = shalt.err (!%p1635_p3)
}
 0x690   : > { %1389 = dma.vmem_to_hbm [thread:$0]  (%p1897_p10), %s2049_s13, 128, %s2047_s14, %s1119_s10  }
 0x691 PF: > { %s2121_s8 = sld [smem:[#allocation15_spill]]  ;;  %s1145_s11 = sand.u32 1, %s1681_s15  }
 0x692   : > { %p2123_p7 = scmp.ge.s32.totalorder %s1701_s20, 2  ;;  %s1146_s9 = scalar_lea.sflag [#allocation4], %s1145_s11 }
 0x697   : > { %p2122_p5 = scmp.ne.s32.totalorder %s2121_s8, 0 }
 0x699   : > { %p1406_p9 = pnand %p2123_p7, %p2122_p5 }
 0x69b   : > { %1676 = dma.done.wait (!%p1406_p9), %s1146_s9, 128  }
 0x69c   : > { %1678 = vsyncadd (!%p1406_p9), %s1146_s9, 4294967168  ;;  %s22_s20 = sadd.s32 1, %s1701_s20   ;;  %s2124_s15 = smov %s1685_s16 }
 0x69d   : > { %p19_p0 = scmp.ge.s32.totalorder %s22_s20, 4   ;;  %s2125_s16 = smov %s1689_s17 }
 0x69e   : > { %s2126_s17 = smov %s1909_s12  ;;  %s2127_s18 = smov %s1697_s19 }
 0x69f   : > { %s2128_s19 = smov %s2130_s26  ;;  %21 = sbr.rel (!%p19_p0) target bundleno = 8 (0x8), region = 93 }
 0x6a6   :  { %1151 = vsyncpa [#allocation3], 1 }
 0x6a7   :  { %1153 = vsyncpa [#allocation3 + $0x1], 1 }
 0x6a8   :  { %1154 = vsyncpa [#allocation6], 1 }
 0x6a9   :  { %1155 = vsyncpa [#allocation9], 1 }
 0x6aa   :  { %1156 = vsyncpa [#allocation4], 1 }
 0x6ab   :  { %1158 = vsyncpa [#allocation4 + $0x1], 1 }

</bundles_post_ra>
